<compile_context>
chip_gen: v7x
topology: tpu7x:2x2x1
jax: 0.10.0
libtpu: 0.0.40
codegen_flags: <defaults>
</compile_context>

<pallas_src>
import math

import jax
import jax.numpy as jnp
from jax.experimental import pallas as pl
from jax.experimental.pallas import tpu as pltpu


# ----------------------------- hyper-parameters ------------------------------
SEG_LEN = 8                          # self.seg_len
DIM = 32                             # dim  (== ts_len so res_linear shapes line up)
SEG_DIM = 10                         # seg_dim
BATCH = 2
SEG_NUM = DIM // SEG_LEN             # ts_len / seg_len
D_IN = SEG_DIM * SEG_NUM * DIM       # res_linear input features (1280)
LN_EPS = 1e-5


# --------------------------------- kernel ------------------------------------
def dsf_fused_kernel(e_ref, w_ref, p_ref, o_ref):
    """out = LayerNorm(e @ W_eff + b_eff) * gamma + beta, fully fused.

    p_ref packs [b_eff; gamma; beta] as a (3, D) lane-dense block.
    """
    h = jnp.dot(e_ref[...], w_ref[...], preferred_element_type=jnp.float32)
    h = h + p_ref[0:1, :]                                   # + b_eff
    mean = jnp.mean(h, axis=-1, keepdims=True)
    c = h - mean
    var = jnp.mean(c * c, axis=-1, keepdims=True)           # biased, like torch LayerNorm
    y = c * jax.lax.rsqrt(var + LN_EPS)
    o_ref[...] = y * p_ref[1:2, :] + p_ref[2:3, :]          # * gamma + beta


# ------------------------------ pallas wrapper --------------------------------
@jax.jit
def dsf_embedding(e, w_eff, packed):
    B, _ = e.shape
    D = w_eff.shape[1]
    vmem = pl.BlockSpec(memory_space=pltpu.MemorySpace.VMEM)
    # Single invocation, whole-array blocks: <10 KiB live data, launch-bound.
    return pl.pallas_call(
        dsf_fused_kernel,
        out_shape=jax.ShapeDtypeStruct((B, D), jnp.float32),
        in_specs=[vmem, vmem, vmem],
        out_specs=vmem,
    )(e, w_eff, packed)


# ----------------------- parameter folding (done once) ------------------------
def fold_params(w1, b1, w2, b2, w3, b3):
    """Fold dim_linear + segment linear + res_linear into (W_eff, b_eff).

    flat[b, (s*SN + n)*D + d] = w1[s] * sum_l e[b, n*L+l] * w2[l, d]
                                + b1[s] * colsum(w2)[d] + b2[d]
    out = flat @ w3 + b3
        = e @ W_eff + b_eff
    """
    S = w1.shape[0]
    L, D = w2.shape
    SN = w3.shape[0] // (S * D)
    w3r = w3.reshape(S, SN, D, D)                                  # [s, n, d, j]
    # W_eff[n*L + l, j] = sum_{s,d} w1[s] * w2[l, d] * w3r[s, n, d, j]
    w_eff = jnp.einsum('s,ld,sndj->nlj', w1, w2, w3r).reshape(SN * L, D)
    # b_eff[j] = sum_{s,n,d} (b1[s]*colsum_w2[d] + b2[d]) * w3r[s, n, d, j] + b3[j]
    per_sd = b1[:, None] * jnp.sum(w2, axis=0)[None, :] + b2.reshape(1, D)   # (S, D)
    b_eff = jnp.einsum('sd,sndj->j', per_sd, w3r) + b3.reshape(D)
    return w_eff, b_eff.reshape(1, D)


# ------------------------------- reference -----------------------------------
def dsf_embedding_ref(e, w1, b1, w2, b2, w3, b3, gamma, beta):
    # dim_linear: (B, T, 1) @ (1, S)
    h = e[:, :, None] * w1[None, None, :] + b1[None, None, :]        # (B, T, S)
    B, T, S = h.shape
    L, D = w2.shape
    seg_num = T // L
    # 'b (seg_num seg_len) d -> (b d seg_num) seg_len'
    seg = jnp.transpose(h, (0, 2, 1)).reshape(B * S * seg_num, L)
    emb = seg @ w2 + b2
    flat = emb.reshape(B, S * seg_num * D)
    out = flat @ w3 + b3
    mean = out.mean(-1, keepdims=True)
    var = ((out - mean) ** 2).mean(-1, keepdims=True)
    return (out - mean) / jnp.sqrt(var + LN_EPS) * gamma + beta


# --------------------------------- params -------------------------------------
def init_params(key):
    ks = jax.random.split(key, 6)

    def uni(k, shape, fan_in):
        s = 1.0 / math.sqrt(fan_in)
        return jax.random.uniform(k, shape, jnp.float32, -s, s)

    # dim_linear: Linear(1, seg_dim)
    w1 = uni(ks[0], (SEG_DIM,), 1)
    b1 = uni(ks[1], (SEG_DIM,), 1)
    # linear: Linear(seg_len, dim) -> transposed weight (seg_len, dim)
    w2 = uni(ks[2], (SEG_LEN, DIM), SEG_LEN)
    b2 = uni(ks[3], (1, DIM), SEG_LEN)
    # res_linear: Linear(D_IN, dim) -> transposed weight (D_IN, dim)
    w3 = uni(ks[4], (D_IN, DIM), D_IN)
    b3 = uni(ks[5], (1, DIM), D_IN)
    # LayerNorm(dim): default torch init
    gamma = jnp.ones((1, DIM), jnp.float32)
    beta = jnp.zeros((1, DIM), jnp.float32)
    return w1, b1, w2, b2, w3, b3, gamma, beta


# ----------------------------------- main --------------------------------------
if __name__ == "__main__":
    key = jax.random.PRNGKey(0)
    k_e, k_p = jax.random.split(key)
    e = jax.random.normal(k_e, (BATCH, DIM), jnp.float32)   # ts_len == dim
    w1, b1, w2, b2, w3, b3, gamma, beta = init_params(k_p)

    # One-time algebraic fold of all linear layers (valid because dropout is
    # identity in eval mode).
    w_eff, b_eff = fold_params(w1, b1, w2, b2, w3, b3)
    packed = jnp.concatenate([b_eff, gamma, beta], axis=0)   # (3, DIM) lane-dense

    out = dsf_embedding(e, w_eff, packed)
    out = jax.block_until_ready(out)

    ref = dsf_embedding_ref(e, w1, b1, w2, b2, w3, b3, gamma, beta)
    assert out.shape == (BATCH, DIM)
    assert jnp.allclose(out, ref, atol=5e-4, rtol=5e-4), (
        f"max err {jnp.max(jnp.abs(out - ref))}"
    )
    print("KERNEL_OK")
</pallas_src>

<mosaic_0001>
module attributes {stable_mosaic.version = 11 : i64} {
  func.func @dsf_fused_kernel(%arg0: memref<2x32xf32, #tpu.memory_space<vmem>>, %arg1: memref<32x32xf32, #tpu.memory_space<vmem>>, %arg2: memref<3x32xf32, #tpu.memory_space<vmem>>, %arg3: memref<2x32xf32, #tpu.memory_space<vmem>>) attributes {dimension_semantics = [], scalar_prefetch = 0 : i64, scratch_operands = 0 : i64, tpu.core_type = #tpu.core_type<tc>} {
    %c0 = arith.constant 0 : index
    %c0_0 = arith.constant 0 : index
    %0 = vector.load %arg0[%c0, %c0_0] : memref<2x32xf32, #tpu.memory_space<vmem>>, vector<2x32xf32>
    %c0_1 = arith.constant 0 : index
    %c0_2 = arith.constant 0 : index
    %1 = vector.load %arg1[%c0_1, %c0_2] : memref<32x32xf32, #tpu.memory_space<vmem>>, vector<32x32xf32>
    %cst = arith.constant dense<0.000000e+00> : vector<2x32xf32>
    %2 = tpu.matmul %0, %1, %cst {dimension_numbers = #tpu.dot_dimension_numbers<[1], [0], [0], [1], [0, 0, 1, 1], [], []>} : vector<2x32xf32>, vector<32x32xf32>, vector<2x32xf32> -> vector<2x32xf32>
    %c0_3 = arith.constant 0 : index
    %c0_4 = arith.constant 0 : index
    %3 = vector.load %arg2[%c0_3, %c0_4] : memref<3x32xf32, #tpu.memory_space<vmem>>, vector<1x32xf32>
    %4 = vector.broadcast %3 : vector<1x32xf32> to vector<2x32xf32>
    %5 = arith.addf %2, %4 : vector<2x32xf32>
    %cst_5 = arith.constant dense<0.000000e+00> : vector<2xf32>
    %6 = vector.multi_reduction <add>, %5, %cst_5 [1] : vector<2x32xf32> to vector<2xf32>
    %7 = vector.shape_cast %6 : vector<2xf32> to vector<2x1xf32>
    %cst_6 = arith.constant 3.200000e+01 : f32
    %8 = vector.broadcast %cst_6 : f32 to vector<2x1xf32>
    %9 = arith.divf %7, %8 : vector<2x1xf32>
    %10 = vector.broadcast %9 : vector<2x1xf32> to vector<2x32xf32>
    %11 = arith.subf %5, %10 : vector<2x32xf32>
    %12 = arith.mulf %11, %11 : vector<2x32xf32>
    %cst_7 = arith.constant dense<0.000000e+00> : vector<2xf32>
    %13 = vector.multi_reduction <add>, %12, %cst_7 [1] : vector<2x32xf32> to vector<2xf32>
    %14 = vector.shape_cast %13 : vector<2xf32> to vector<2x1xf32>
    %cst_8 = arith.constant 3.200000e+01 : f32
    %15 = vector.broadcast %cst_8 : f32 to vector<2x1xf32>
    %16 = arith.divf %14, %15 : vector<2x1xf32>
    %cst_9 = arith.constant 9.99999974E-6 : f32
    %17 = vector.broadcast %cst_9 : f32 to vector<2x1xf32>
    %18 = arith.addf %16, %17 : vector<2x1xf32>
    %19 = math.rsqrt %18 : vector<2x1xf32>
    %20 = vector.broadcast %19 : vector<2x1xf32> to vector<2x32xf32>
    %21 = arith.mulf %11, %20 : vector<2x32xf32>
    %c1 = arith.constant 1 : index
    %c0_10 = arith.constant 0 : index
    %22 = vector.load %arg2[%c1, %c0_10] : memref<3x32xf32, #tpu.memory_space<vmem>>, vector<1x32xf32>
    %23 = vector.broadcast %22 : vector<1x32xf32> to vector<2x32xf32>
    %24 = arith.mulf %21, %23 : vector<2x32xf32>
    %c2 = arith.constant 2 : index
    %c0_11 = arith.constant 0 : index
    %25 = vector.load %arg2[%c2, %c0_11] : memref<3x32xf32, #tpu.memory_space<vmem>>, vector<1x32xf32>
    %26 = vector.broadcast %25 : vector<1x32xf32> to vector<2x32xf32>
    %27 = arith.addf %24, %26 : vector<2x32xf32>
    %c0_12 = arith.constant 0 : index
    %c0_13 = arith.constant 0 : index
    %28 = vector.load %arg3[%c0_12, %c0_13] : memref<2x32xf32, #tpu.memory_space<vmem>>, vector<2x32xf32>
    tpu.vector_store %arg3[%c0_12, %c0_13], %27 {strides = array<i32>} : memref<2x32xf32, #tpu.memory_space<vmem>>, vector<2x32xf32>,
    return
  }
}

</mosaic_0001>

<bundles_post_ra>
// kernel: dsf_embedding.1
= control target key start
LH: loop header
LB: loop body
LE: loop exit
PB: predicated region body
PF: predicated region fallthrough
CT: control target
= control target key end

     0   :  { %8 = vsyncpa [#allocation3], 0  ;;  %s360_s0 = inlined_call_operand.hbm [shape: f32[2,32], index: 0, kind: input, shape index: {}]   ;;  %s361_s1 = inlined_call_operand.hbm [shape: f32[32,32], index: 1, kind: input, shape index: {}]   ;;  %s362_s2 = inlined_call_operand.vmem [shape: f32[3,32], index: 2, kind: input, shape index: {}]   ;;  %s363_s3 = inlined_call_operand.hbm [shape: f32[2,32], index: 3, kind: output, shape index: {}]  }
   0x1   :  { %9 = vsyncpa [#allocation6], 0 }
   0x2   :  { %10 = vsyncpa [#allocation4], 0  ;;  %s277_s12 = smov [#allocation2]   ;;  %s278_s14 = smov [#allocation5]  }
   0x3   :  { %s17_s13 = sshll.u32 %s277_s12, 4  ;;  %s26_s15 = sshll.u32 %s278_s14, 4  ;;  %s18_s13 = int_to_ptr.vmem [resolvable:$true] %s17_s13  ;;  %s305_s15 = int_to_ptr.vmem [resolvable:$true] %s26_s15 }
   0x4   :  { %s205_s18 = scalar_lea.hbm %s360_s0, 32 }
   0x5   :  { %p206_p0 = scmp.ne.s32.totalorder %s360_s0, %s205_s18  ;;  %p209_p1 = scmp.lt.u32.totalorder %s205_s18, %s360_s0 }
   0x7   :  { %p211_p2 = pnand %p209_p1, %p206_p0 }
   0x9   :  { %214 = shalt.err (!%p211_p2)
}
   0xa   :  { %s215_s23 = scalar_lea.vmem %s18_s13, 32  ;;  %p220_p4 = scmp.lt.s32.totalorder %s18_s13, %s18_s13 }
   0xb   :  { %p216_p3 = scmp.ne.s32.totalorder %s18_s13, %s215_s23  ;;  %p221_p5 = scmp.lt.s32.totalorder %s215_s23, %s215_s23 }
   0xd   :  { %p222_p6 = por %p221_p5, %p220_p4 }
   0xf   :  { %p223_p7 = pnand %p222_p6, %p216_p3 }
  0x11   :  { %226 = shalt.err (!%p223_p7)
}
  0x12   :  { %20 = dma.hbm_to_vmem [thread:$0]  %s360_s0, 32, %s18_s13, [#allocation3]  }
  0x13   :  { %s227_s28 = scalar_lea.hbm %s361_s1, 512 }
  0x14   :  { %p228_p8 = scmp.ne.s32.totalorder %s361_s1, %s227_s28  ;;  %p231_p9 = scmp.lt.u32.totalorder %s227_s28, %s361_s1 }
  0x16   :  { %p233_p10 = pnand %p231_p9, %p228_p8 }
  0x18   :  { %236 = shalt.err (!%p233_p10)
}
  0x19   :  { %s237_s6 = scalar_lea.vmem %s305_s15, 512  ;;  %p242_p12 = scmp.lt.s32.totalorder %s305_s15, %s305_s15 }
  0x1a   :  { %p238_p11 = scmp.ne.s32.totalorder %s305_s15, %s237_s6  ;;  %p243_p13 = scmp.lt.s32.totalorder %s237_s6, %s237_s6 }
  0x1c   :  { %p244_p0 = por %p243_p13, %p242_p12 }
  0x1e   :  { %p245_p1 = pnand %p244_p0, %p238_p11 }
  0x20   :  { %248 = shalt.err (!%p245_p1)
}
  0x21   :  { %s279_s0 = smov 128   ;;  %s280_s7 = smov 8  }
  0x22   :  { %32 = dma.hbm_to_vmem [thread:$0]  %s361_s1, 512, %s305_s15, [#allocation6], %s279_s0, %s279_s0, %s280_s7  }
  0x23   :  { %271 = dma.done.wait [#allocation3], 32  }
  0x24   :  { %272 = vsyncadd [#allocation3], 4294967264 }
  0x25   :  { %273 = dma.done.wait [#allocation6], 512  }
  0x26   :  { %274 = vsyncadd [#allocation6], 4294966784  ;;  %v281_v0 = vmov 0.0|0.0   ;;  %vm282_vm0 = vmmov 0   ;;  %v283_v1 = vmov 0.0   ;;  %v42_v2 = vld [vmem:[#allocation5] sm:$0xff] }
  0x27   :  { %189 = vmatprep.subr.bf16.mxu0 %v281_v0  ;;  %186 = vmatprep.mubr.msk.f32.mxu0 %vm282_vm0, %v283_v1  ;;  %v43_v3 = vld [vmem:[#allocation5 + $0x8] sm:$0xff]  ;;  %v44_v4 = vld [vmem:[#allocation5 + $0x10] sm:$0xff]  ;;  %v45_v6 = vld [vmem:[#allocation5 + $0x18] sm:$0xff]  ;;  %vm51_vm1 = vcmask 261120   ;;  %vm125_vm2 = vcmask 254976   ;;  %s284_s15 = smov [#allocation7]  }
  0x28   :  { %v190_v5 = vpack.c.bf16 %v43_v3, %v42_v2  ;;  %v193_v7 = vpack.c.bf16 %v45_v6, %v44_v4  ;;  %v41_v8 = vld [vmem:[#allocation2] sm:$0x3]  ;;  %v169_v9 = vld [vmem:[%s362_s2] ss:$0 sm:$0xff]  ;;  %v171_v23 = vld [vmem:[%s362_s2 + $0x1] ss:$0 sm:$0xff] }
  0x29   :  { %v172_v25 = vld [vmem:[%s362_s2 + $0x2] ss:$0 sm:$0xff]  ;;  %s159_s16 = sshll.u32 %s284_s15, 4  ;;  %s160_s16 = int_to_ptr.vmem [resolvable:$true] %s159_s16 }
  0x2a   :  { %191 = vmatpush3.bf16.msra.mxu0 %v190_v5  ;;  %s249_s17 = scalar_lea.vmem %s160_s16, 32  ;;  %p254_p3 = scmp.lt.s32.totalorder %s160_s16, %s160_s16 }
  0x2b   :  { %192 = vmatprep.subr.bf16.mxu0 %v281_v0  ;;  %p250_p2 = scmp.ne.s32.totalorder %s160_s16, %s249_s17  ;;  %p255_p4 = scmp.lt.s32.totalorder %s249_s17, %s249_s17 }
  0x2d   :  { %p256_p5 = por %p255_p4, %p254_p3 }
  0x2e   :  { %194 = vmatpush3.bf16.msra.mxu0 %v193_v7 }
  0x2f   :  { %p257_p6 = pnand %p256_p5, %p250_p2 }
  0x31   :  { %187 = vmatmul.mubr.msk.f32.vlgmr.msra.gmra.mrb[0].mxu0 %vm51_vm1, %v41_v8 }
 0x104   :  { %v121_v10 = vpop.f32.mrb[0].mxu0 }
 0x105   :  { %v122_v11 = vadd.f32 %v169_v9, %v121_v10  ;;  %v188_v12 = vpop.f32.mrb[1].mxu0 }
 0x107   :  { %v126_v13 = vsel %vm125_vm2, %v122_v11, 0.0 }
 0x108   :  { %127 = vadd.xlane.f32.xlu0 %v126_v13 }
 0x195   :  { %v128_v14 = vpop.xlane.xlu0 %127 }
 0x196   :  { %v130_v15 = vmul.f32 0.03125, %v128_v14 }
 0x198   :  { %v131_v16 = vsub.f32 %v122_v11, %v130_v15 }
 0x19a   :  { %v132_v17 = vmul.f32 %v131_v16, %v131_v16 }
 0x19c   :  { %v133_v18 = vsel %vm125_vm2, %v132_v17, 0.0 }
 0x19d   :  { %134 = vadd.xlane.f32.xlu0 %v133_v18 }
 0x22a   :  { %v135_v19 = vpop.xlane.xlu0 %134 }
 0x22b   :  { %v136_v20 = vmul.f32 0.03125, %v135_v19 }
 0x22d   :  { %v137_v21 = vadd.f32 1e-05, %v136_v20 }
 0x22f   :  { %203 = vrsqrt.f32 %v137_v21 }
 0x239   :  { %v204_v22 = vpop.eup %203 }
 0x23a   :  { %v139_v24 = vmul.f32 %v204_v22, %v131_v16 }
 0x23c   :  { %v145_v26 = vmul.f32 %v171_v23, %v139_v24 }
 0x23e   :  { %v151_v27 = vadd.f32 %v172_v25, %v145_v26 }
 0x240   :  { %152 = vst.msk [vmem:[#allocation7] sm:$0x3] %vm125_vm2, %v151_v27 }
 0x241   :  { %260 = shalt.err (!%p257_p6)
}
 0x242   :  { %s261_s20 = scalar_lea.hbm %s363_s3, 32 }
 0x243   :  { %p262_p7 = scmp.ne.s32.totalorder %s363_s3, %s261_s20  ;;  %p265_p8 = scmp.lt.u32.totalorder %s261_s20, %s363_s3 }
 0x245   :  { %p267_p9 = pnand %p265_p8, %p262_p7 }
 0x247   :  { %270 = shalt.err (!%p267_p9)
}
 0x248   :  { %162 = dma.vmem_to_hbm [thread:$0]  %s160_s16, 32, %s363_s3, [#allocation4]  }
 0x249   :  { %275 = dma.done.wait [#allocation4], 32  }
 0x24a   :  { %276 = vsyncadd [#allocation4], 4294967264 }
 0x24b   :  { %166 = vsyncpa [#allocation3], 1 }
 0x24c   :  { %167 = vsyncpa [#allocation6], 1 }
 0x24d   :  { %168 = vsyncpa [#allocation4], 1 }

</bundles_post_ra>
